<compile_context>
chip_gen: v5e
topology: v5e:2x2
jax: 0.10.0
libtpu: 0.0.40
codegen_flags: <defaults>
</compile_context>

<pallas_src>
import math
import jax
import jax.numpy as jnp
from jax.experimental import pallas as pl
from jax.experimental.pallas import tpu as pltpu


def _round_up(x, m):
    return (x + m - 1) // m * m


def _make_ffn_kernel(d_model_actual, eps=1e-5):
    """Kernel factory closing over static shape info (real feature width)."""
    inv_d = 1.0 / float(d_model_actual)

    def kernel(x_ref, w1_ref, b1_ref, w2_ref, b2_ref, g_ref, beta_ref,
               o_ref, acc_ref):
        k = pl.program_id(1)

        @pl.when(k == 0)
        def _():
            acc_ref[...] = jnp.zeros_like(acc_ref)

        x = x_ref[...]                                   # (tm, d_pad)

        # linear1 chunk + bias + relu  (d_model -> fk), f32 MXU accumulation
        h = jnp.dot(x, w1_ref[...], preferred_element_type=jnp.float32)
        h = jnp.maximum(h + b1_ref[...].astype(jnp.float32), 0.0)

        # linear2 chunk (fk -> d_model), accumulated over the ff grid axis
        acc_ref[...] += jnp.dot(h.astype(w2_ref.dtype), w2_ref[...],
                                preferred_element_type=jnp.float32)

        @pl.when(k == pl.num_programs(1) - 1)
        def _():
            # residual + linear2 bias (dropout is identity with p = 0.0)
            y = (x.astype(jnp.float32) + acc_ref[...]
                 + b2_ref[...].astype(jnp.float32))

            # LayerNorm over the real d_model columns. Padded columns of y are
            # exactly zero, so plain sums scaled by 1/d_model are correct.
            mean = jnp.sum(y, axis=-1, keepdims=True) * inv_d
            mean_sq = jnp.sum(y * y, axis=-1, keepdims=True) * inv_d
            var = jnp.maximum(mean_sq - mean * mean, 0.0)
            y_norm = (y - mean) * jax.lax.rsqrt(var + eps)   # EUP rsqrt

            o_ref[...] = (y_norm * g_ref[...].astype(jnp.float32)
                          + beta_ref[...].astype(jnp.float32)).astype(o_ref.dtype)

    return kernel


def ffn_layer(tgt, w1, b1, w2, b2, gamma, beta, *, tm=512,
              vmem_budget_bytes=64 * 1024 * 1024):
    """tgt: (seq, batch, d_model). Returns same shape/dtype (forward_post)."""
    seq, batch, d_model = tgt.shape
    dim_ff = w1.shape[1]
    n = seq * batch

    compute_dtype = tgt.dtype
    cbytes = jnp.dtype(compute_dtype).itemsize

    d_pad = _round_up(d_model, 128)

    # ---- tile selection: first the ff chunk (fk), then the row tile (tm) ----
    target = int(vmem_budget_bytes * 0.85)

    def estimate(tm_, fk_):
        weights = 2 * 2 * d_pad * fk_ * cbytes        # w1 + w2 blocks, dbuffered
        vecs = 2 * (fk_ + 3 * d_pad) * 4              # biases / LN params
        io = 2 * 2 * tm_ * d_pad * cbytes             # x + out tiles, dbuffered
        acc = tm_ * d_pad * 4                         # f32 accumulator (scratch)
        hid = tm_ * fk_ * 4                           # f32 hidden chunk
        return weights + vecs + io + acc + hid

    fk = _round_up(dim_ff, 128)
    while fk > 512 and estimate(128, fk) > target:
        fk = _round_up(fk // 2, 128)
    f_pad = _round_up(dim_ff, fk)
    nk = f_pad // fk

    tm = max(8, min(_round_up(tm, 8), _round_up(n, 8)))
    while tm > 64 and estimate(tm, fk) > target:
        tm = _round_up(tm // 2, 8)

    n_pad = _round_up(n, tm)
    grid = (n_pad // tm, nk)

    # ---- zero padding keeps padded columns of y exactly zero ----
    x2d = tgt.reshape(n, d_model).astype(compute_dtype)
    x_p = jnp.pad(x2d, ((0, n_pad - n), (0, d_pad - d_model)))
    w1_p = jnp.pad(w1, ((0, d_pad - d_model), (0, f_pad - dim_ff))).astype(compute_dtype)
    b1_p = jnp.pad(b1, ((0, 0), (0, f_pad - dim_ff)))
    w2_p = jnp.pad(w2, ((0, f_pad - dim_ff), (0, d_pad - d_model))).astype(compute_dtype)
    b2_p = jnp.pad(b2, ((0, 0), (0, d_pad - d_model)))
    g_p = jnp.pad(gamma, ((0, 0), (0, d_pad - d_model)))
    beta_p = jnp.pad(beta, ((0, 0), (0, d_pad - d_model)))

    kernel = _make_ffn_kernel(d_model)

    weight_bytes = 2 * d_pad * f_pad * cbytes
    weight_reads = grid[0] if nk > 1 else 1
    cost = pl.CostEstimate(
        flops=4 * n_pad * d_pad * f_pad,
        transcendentals=n_pad,
        bytes_accessed=(2 * n_pad * d_pad * cbytes            # x in, out
                        + weight_reads * weight_bytes          # w1 + w2
                        + (f_pad + 3 * d_pad) * 4))            # biases / LN params

    out = pl.pallas_call(
        kernel,
        out_shape=jax.ShapeDtypeStruct((n_pad, d_pad), tgt.dtype),
        grid_spec=pltpu.PrefetchScalarGridSpec(
            num_scalar_prefetch=0,
            grid=grid,
            in_specs=[
                pl.BlockSpec((tm, d_pad), lambda i, k: (i, 0)),     # x (resident across k)
                pl.BlockSpec((d_pad, fk), lambda i, k: (0, k)),     # w1 chunk
                pl.BlockSpec((1, fk), lambda i, k: (0, k)),         # b1 chunk
                pl.BlockSpec((fk, d_pad), lambda i, k: (k, 0)),     # w2 chunk
                pl.BlockSpec((1, d_pad), lambda i, k: (0, 0)),      # b2
                pl.BlockSpec((1, d_pad), lambda i, k: (0, 0)),      # gamma
                pl.BlockSpec((1, d_pad), lambda i, k: (0, 0)),      # beta
            ],
            out_specs=pl.BlockSpec((tm, d_pad), lambda i, k: (i, 0)),
            scratch_shapes=[pltpu.VMEM((tm, d_pad), jnp.float32)],
        ),
        compiler_params=pltpu.CompilerParams(
            dimension_semantics=("parallel", "arbitrary"),
            vmem_limit_bytes=vmem_budget_bytes,
        ),
        cost_estimate=cost,
    )(x_p, w1_p, b1_p, w2_p, b2_p, g_p, beta_p)

    return out[:n, :d_model].reshape(seq, batch, d_model)


def init_params(key, d_model, dim_feedforward):
    """Matches FFNLayer.__init__ / _reset_parameters:
    weights -> xavier_uniform_, biases -> nn.Linear default, LayerNorm -> ones/zeros."""
    k1, k2, k3, k4 = jax.random.split(key, 4)

    def xavier_uniform(k, fan_in, fan_out):
        limit = math.sqrt(6.0 / (fan_in + fan_out))
        # stored as (in, out) so the kernel computes x @ W
        return jax.random.uniform(k, (fan_in, fan_out), jnp.float32, -limit, limit)

    w1 = xavier_uniform(k1, d_model, dim_feedforward)
    w2 = xavier_uniform(k2, dim_feedforward, d_model)

    # nn.Linear default bias init: U(-1/sqrt(fan_in), 1/sqrt(fan_in))
    bl1 = 1.0 / math.sqrt(d_model)
    bl2 = 1.0 / math.sqrt(dim_feedforward)
    b1 = jax.random.uniform(k3, (1, dim_feedforward), jnp.float32, -bl1, bl1)
    b2 = jax.random.uniform(k4, (1, d_model), jnp.float32, -bl2, bl2)

    gamma = jnp.ones((1, d_model), jnp.float32)
    beta = jnp.zeros((1, d_model), jnp.float32)
    return w1, b1, w2, b2, gamma, beta


def reference_ffn(tgt, w1, b1, w2, b2, gamma, beta):
    h = jnp.maximum(tgt @ w1 + b1[0], 0.0)
    tgt2 = h @ w2 + b2[0]
    y = tgt + tgt2
    mean = jnp.mean(y, axis=-1, keepdims=True)
    var = jnp.mean((y - mean) ** 2, axis=-1, keepdims=True)
    return (y - mean) * jax.lax.rsqrt(var + 1e-5) * gamma[0] + beta[0]


if __name__ == "__main__":
    d_model = 32
    dim_feedforward = 64
    seq, batch = 8, 2

    key = jax.random.PRNGKey(0)
    kx, kp = jax.random.split(key)

    tgt = jax.random.normal(kx, (seq, batch, d_model), jnp.float32)
    params = init_params(kp, d_model, dim_feedforward)

    out = ffn_layer(tgt, *params)
    out = jax.block_until_ready(out)

    ref = reference_ffn(tgt, *params)
    assert out.shape == tgt.shape and out.dtype == tgt.dtype
    assert jnp.allclose(out, ref, atol=1e-4, rtol=1e-4), "mismatch vs reference"

    print("KERNEL_OK")
</pallas_src>

<mosaic_0001>
module attributes {stable_mosaic.version = 11 : i64} {
  func.func @kernel(%arg0: i32, %arg1: i32, %arg2: memref<16x128xf32, #tpu.memory_space<vmem>>, %arg3: memref<128x128xf32, #tpu.memory_space<vmem>>, %arg4: memref<1x128xf32, #tpu.memory_space<vmem>>, %arg5: memref<128x128xf32, #tpu.memory_space<vmem>>, %arg6: memref<1x128xf32, #tpu.memory_space<vmem>>, %arg7: memref<1x128xf32, #tpu.memory_space<vmem>>, %arg8: memref<1x128xf32, #tpu.memory_space<vmem>>, %arg9: memref<16x128xf32, #tpu.memory_space<vmem>>, %arg10: memref<16x128xf32, #tpu.memory_space<vmem>>) attributes {dimension_semantics = [#tpu.dimension_semantics<parallel>, #tpu.dimension_semantics<arbitrary>], iteration_bounds = array<i64: 1, 1>, scalar_prefetch = 0 : i64, scratch_operands = 1 : i64, tpu.core_type = #tpu.core_type<tc>, window_params = [{transform_indices = @transform_0, window_bounds = array<i64: 16, 128>}, {transform_indices = @transform_1, window_bounds = array<i64: 128, 128>}, {transform_indices = @transform_2, window_bounds = array<i64: 1, 128>}, {transform_indices = @transform_3, window_bounds = array<i64: 128, 128>}, {pipeline_mode = #tpu.pipeline_mode<synchronous>, transform_indices = @transform_4, window_bounds = array<i64: 1, 128>}, {pipeline_mode = #tpu.pipeline_mode<synchronous>, transform_indices = @transform_5, window_bounds = array<i64: 1, 128>}, {pipeline_mode = #tpu.pipeline_mode<synchronous>, transform_indices = @transform_6, window_bounds = array<i64: 1, 128>}, {transform_indices = @transform_7, window_bounds = array<i64: 16, 128>}]} {
    %c0_i32 = arith.constant 0 : i32
    %0 = arith.cmpi eq, %arg1, %c0_i32 : i32
    %1 = arith.extui %0 : i1 to i32
    %c0_i32_0 = arith.constant 0 : i32
    %2 = arith.cmpi ne, %1, %c0_i32_0 : i32
    scf.if %2 {
      %cst_16 = arith.constant 0.000000e+00 : f32
      %19 = vector.broadcast %cst_16 : f32 to vector<16x128xf32>
      %c0_17 = arith.constant 0 : index
      %c0_18 = arith.constant 0 : index
      %20 = vector.load %arg10[%c0_17, %c0_18] : memref<16x128xf32, #tpu.memory_space<vmem>>, vector<16x128xf32>
      tpu.vector_store %arg10[%c0_17, %c0_18], %19 {strides = array<i32>} : memref<16x128xf32, #tpu.memory_space<vmem>>, vector<16x128xf32>,
    } else {
    }
    %c0 = arith.constant 0 : index
    %c0_1 = arith.constant 0 : index
    %3 = vector.load %arg2[%c0, %c0_1] : memref<16x128xf32, #tpu.memory_space<vmem>>, vector<16x128xf32>
    %c0_2 = arith.constant 0 : index
    %c0_3 = arith.constant 0 : index
    %4 = vector.load %arg3[%c0_2, %c0_3] : memref<128x128xf32, #tpu.memory_space<vmem>>, vector<128x128xf32>
    %cst = arith.constant dense<0.000000e+00> : vector<16x128xf32>
    %5 = tpu.matmul %3, %4, %cst {dimension_numbers = #tpu.dot_dimension_numbers<[1], [0], [0], [1], [0, 0, 1, 1], [], []>} : vector<16x128xf32>, vector<128x128xf32>, vector<16x128xf32> -> vector<16x128xf32>
    %c0_4 = arith.constant 0 : index
    %c0_5 = arith.constant 0 : index
    %6 = vector.load %arg4[%c0_4, %c0_5] : memref<1x128xf32, #tpu.memory_space<vmem>>, vector<1x128xf32>
    %7 = vector.broadcast %6 : vector<1x128xf32> to vector<16x128xf32>
    %8 = arith.addf %5, %7 : vector<16x128xf32>
    %cst_6 = arith.constant 0.000000e+00 : f32
    %9 = vector.broadcast %cst_6 : f32 to vector<16x128xf32>
    %10 = arith.maximumf %8, %9 : vector<16x128xf32>
    %c0_7 = arith.constant 0 : index
    %c0_8 = arith.constant 0 : index
    %11 = vector.load %arg10[%c0_7, %c0_8] : memref<16x128xf32, #tpu.memory_space<vmem>>, vector<16x128xf32>
    %c0_9 = arith.constant 0 : index
    %c0_10 = arith.constant 0 : index
    %12 = vector.load %arg5[%c0_9, %c0_10] : memref<128x128xf32, #tpu.memory_space<vmem>>, vector<128x128xf32>
    %cst_11 = arith.constant dense<0.000000e+00> : vector<16x128xf32>
    %13 = tpu.matmul %10, %12, %cst_11 {dimension_numbers = #tpu.dot_dimension_numbers<[1], [0], [0], [1], [0, 0, 1, 1], [], []>} : vector<16x128xf32>, vector<128x128xf32>, vector<16x128xf32> -> vector<16x128xf32>
    %14 = arith.addf %11, %13 : vector<16x128xf32>
    %c0_12 = arith.constant 0 : index
    %c0_13 = arith.constant 0 : index
    %15 = vector.load %arg10[%c0_12, %c0_13] : memref<16x128xf32, #tpu.memory_space<vmem>>, vector<16x128xf32>
    tpu.vector_store %arg10[%c0_12, %c0_13], %14 {strides = array<i32>} : memref<16x128xf32, #tpu.memory_space<vmem>>, vector<16x128xf32>,
    %c0_i32_14 = arith.constant 0 : i32
    %16 = arith.cmpi eq, %arg1, %c0_i32_14 : i32
    %17 = arith.extui %16 : i1 to i32
    %c0_i32_15 = arith.constant 0 : i32
    %18 = arith.cmpi ne, %17, %c0_i32_15 : i32
    scf.if %18 {
      %c0_16 = arith.constant 0 : index
      %c0_17 = arith.constant 0 : index
      %19 = vector.load %arg10[%c0_16, %c0_17] : memref<16x128xf32, #tpu.memory_space<vmem>>, vector<16x128xf32>
      %20 = arith.addf %3, %19 : vector<16x128xf32>
      %c0_18 = arith.constant 0 : index
      %c0_19 = arith.constant 0 : index
      %21 = vector.load %arg6[%c0_18, %c0_19] : memref<1x128xf32, #tpu.memory_space<vmem>>, vector<1x128xf32>
      %22 = vector.broadcast %21 : vector<1x128xf32> to vector<16x128xf32>
      %23 = arith.addf %20, %22 : vector<16x128xf32>
      %cst_20 = arith.constant dense<0.000000e+00> : vector<16xf32>
      %24 = vector.multi_reduction <add>, %23, %cst_20 [1] : vector<16x128xf32> to vector<16xf32>
      %25 = vector.shape_cast %24 : vector<16xf32> to vector<16x1xf32>
      %cst_21 = arith.constant 3.125000e-02 : f32
      %26 = vector.broadcast %cst_21 : f32 to vector<16x1xf32>
      %27 = arith.mulf %25, %26 : vector<16x1xf32>
      %28 = arith.mulf %23, %23 : vector<16x128xf32>
      %cst_22 = arith.constant dense<0.000000e+00> : vector<16xf32>
      %29 = vector.multi_reduction <add>, %28, %cst_22 [1] : vector<16x128xf32> to vector<16xf32>
      %30 = vector.shape_cast %29 : vector<16xf32> to vector<16x1xf32>
      %cst_23 = arith.constant 3.125000e-02 : f32
      %31 = vector.broadcast %cst_23 : f32 to vector<16x1xf32>
      %32 = arith.mulf %30, %31 : vector<16x1xf32>
      %33 = arith.mulf %27, %27 : vector<16x1xf32>
      %34 = arith.subf %32, %33 : vector<16x1xf32>
      %cst_24 = arith.constant 0.000000e+00 : f32
      %35 = vector.broadcast %cst_24 : f32 to vector<16x1xf32>
      %36 = arith.maximumf %34, %35 : vector<16x1xf32>
      %37 = vector.broadcast %27 : vector<16x1xf32> to vector<16x128xf32>
      %38 = arith.subf %23, %37 : vector<16x128xf32>
      %cst_25 = arith.constant 9.99999974E-6 : f32
      %39 = vector.broadcast %cst_25 : f32 to vector<16x1xf32>
      %40 = arith.addf %36, %39 : vector<16x1xf32>
      %41 = math.rsqrt %40 : vector<16x1xf32>
      %42 = vector.broadcast %41 : vector<16x1xf32> to vector<16x128xf32>
      %43 = arith.mulf %38, %42 : vector<16x128xf32>
      %c0_26 = arith.constant 0 : index
      %c0_27 = arith.constant 0 : index
      %44 = vector.load %arg7[%c0_26, %c0_27] : memref<1x128xf32, #tpu.memory_space<vmem>>, vector<1x128xf32>
      %45 = vector.broadcast %44 : vector<1x128xf32> to vector<16x128xf32>
      %46 = arith.mulf %43, %45 : vector<16x128xf32>
      %c0_28 = arith.constant 0 : index
      %c0_29 = arith.constant 0 : index
      %47 = vector.load %arg8[%c0_28, %c0_29] : memref<1x128xf32, #tpu.memory_space<vmem>>, vector<1x128xf32>
      %48 = vector.broadcast %47 : vector<1x128xf32> to vector<16x128xf32>
      %49 = arith.addf %46, %48 : vector<16x128xf32>
      %c0_30 = arith.constant 0 : index
      %c0_31 = arith.constant 0 : index
      %50 = vector.load %arg9[%c0_30, %c0_31] : memref<16x128xf32, #tpu.memory_space<vmem>>, vector<16x128xf32>
      tpu.vector_store %arg9[%c0_30, %c0_31], %49 {strides = array<i32>} : memref<16x128xf32, #tpu.memory_space<vmem>>, vector<16x128xf32>,
    } else {
    }
    return
  }
  func.func @transform_0(%arg0: i32, %arg1: i32) -> (i32, i32) {
    %c0_i32 = arith.constant 0 : i32
    %c0_i32_0 = arith.constant 0 : i32
    return %arg0, %c0_i32 : i32, i32
  }
  func.func @transform_1(%arg0: i32, %arg1: i32) -> (i32, i32) {
    %c0_i32 = arith.constant 0 : i32
    %c0_i32_0 = arith.constant 0 : i32
    return %c0_i32, %arg1 : i32, i32
  }
  func.func @transform_2(%arg0: i32, %arg1: i32) -> (i32, i32) {
    %c0_i32 = arith.constant 0 : i32
    %c0_i32_0 = arith.constant 0 : i32
    return %c0_i32, %arg1 : i32, i32
  }
  func.func @transform_3(%arg0: i32, %arg1: i32) -> (i32, i32) {
    %c0_i32 = arith.constant 0 : i32
    %c0_i32_0 = arith.constant 0 : i32
    return %arg1, %c0_i32 : i32, i32
  }
  func.func @transform_4(%arg0: i32, %arg1: i32) -> (i32, i32) {
    %c0_i32 = arith.constant 0 : i32
    %c0_i32_0 = arith.constant 0 : i32
    %c0_i32_1 = arith.constant 0 : i32
    return %c0_i32, %c0_i32_0 : i32, i32
  }
  func.func @transform_5(%arg0: i32, %arg1: i32) -> (i32, i32) {
    %c0_i32 = arith.constant 0 : i32
    %c0_i32_0 = arith.constant 0 : i32
    %c0_i32_1 = arith.constant 0 : i32
    return %c0_i32, %c0_i32_0 : i32, i32
  }
  func.func @transform_6(%arg0: i32, %arg1: i32) -> (i32, i32) {
    %c0_i32 = arith.constant 0 : i32
    %c0_i32_0 = arith.constant 0 : i32
    %c0_i32_1 = arith.constant 0 : i32
    return %c0_i32, %c0_i32_0 : i32, i32
  }
  func.func @transform_7(%arg0: i32, %arg1: i32) -> (i32, i32) {
    %c0_i32 = arith.constant 0 : i32
    %c0_i32_0 = arith.constant 0 : i32
    return %arg0, %c0_i32 : i32, i32
  }
}

</mosaic_0001>

<bundles_post_ra>
// kernel: tpu_custom_call.1
= control target key start
LH: loop header
LB: loop body
LE: loop exit
PB: predicated region body
PF: predicated region fallthrough
CT: control target
= control target key end

     0   :  { %12 = vsyncpa [#allocation4], 0  ;;  %s495_s0 = inlined_call_operand.hbm [shape: f32[16,128], index: 0, kind: input, shape index: {}]   ;;  %s496_s1 = inlined_call_operand.hbm [shape: f32[128,128], index: 1, kind: input, shape index: {}]   ;;  %s497_s2 = inlined_call_operand.vmem [shape: f32[1,128], index: 2, kind: input, shape index: {}]   ;;  %s498_s3 = inlined_call_operand.hbm [shape: f32[128,128], index: 3, kind: input, shape index: {}]   ;;  %s499_s4 = inlined_call_operand.vmem [shape: f32[1,128], index: 4, kind: input, shape index: {}]   ;;  %s500_s5 = inlined_call_operand.vmem [shape: f32[1,128], index: 5, kind: input, shape index: {}]   ;;  %s501_s6 = inlined_call_operand.vmem [shape: f32[1,128], index: 6, kind: input, shape index: {}]   ;;  %s502_s7 = inlined_call_operand.hbm [shape: f32[16,128], index: 7, kind: output, shape index: {}]  }
   0x1   :  { %13 = vsyncpa [#allocation7], 0 }
   0x2   :  { %14 = vsyncpa [#allocation5], 0  ;;  %s32_s26 = sshll.u32 %s496_s1, 4  ;;  %s413_s27 = smov [#allocation6]   ;;  %s33_s26 = int_to_ptr.hbm [resolvable:$true] %s32_s26 }
   0x3   :  { %s34_s28 = sshll.u32 %s413_s27, 4  ;;  %s19_s8 = sshll.u32 %s495_s0, 4  ;;  %s35_s28 = int_to_ptr.vmem [resolvable:$true] %s34_s28  ;;  %s20_s8 = int_to_ptr.hbm [resolvable:$true] %s19_s8 }
   0x4   :  { %s414_s9 = smov 128   ;;  %s415_s10 = smov 8  }
   0x5   :  { %40 = dma.hbm_to_vmem [thread:$0]  %s33_s26, 2048, %s35_s28, [#allocation7], %s414_s9, %s414_s9, %s415_s10  }
   0x6   :  { %s416_s11 = smov [#allocation3]   ;;  %s47_s1 = sshll.u32 %s498_s3, 4  ;;  %s48_s1 = int_to_ptr.hbm [resolvable:$true] %s47_s1 }
   0x7   :  { %s21_s12 = sshll.u32 %s416_s11, 4  ;;  %s417_s0 = smov [#allocation8]   ;;  %s22_s12 = int_to_ptr.vmem [resolvable:$true] %s21_s12 }
   0x8   :  { %27 = dma.hbm_to_vmem [thread:$0]  %s20_s8, 256, %s22_s12, [#allocation4], %s414_s9, %s414_s9, %s415_s10  }
   0x9   :  { %s49_s15 = sshll.u32 %s417_s0, 4  ;;  %s50_s15 = int_to_ptr.vmem [resolvable:$true] %s49_s15 }
   0xa   :  { %55 = dma.hbm_to_vmem [thread:$0]  %s48_s1, 2048, %s50_s15, [#allocation7], %s414_s9, %s414_s9, %s415_s10  }
   0xb   :  { %407 = dma.done.wait [#allocation4], 256  }
   0xc   :  { %408 = vsyncadd [#allocation4], 4294967040 }
   0xd   :  { %409 = dma.done.wait [#allocation7], 4096  }
   0xe   :  { %410 = vsyncadd [#allocation7], 4294963200  ;;  %v97_v0 = vld [vmem:[#allocation6 + $0x78] sm:$0xff]  ;;  %v96_v1 = vld [vmem:[#allocation6 + $0x70] sm:$0xff] }
   0xf   :  { %102 = vmatpush.msra.mxu0 %v97_v0  ;;  %265 = vmatpush.msra.mxu2 %v97_v0  ;;  %v95_v2 = vld [vmem:[#allocation6 + $0x68] sm:$0xff]  ;;  %v94_v3 = vld [vmem:[#allocation6 + $0x60] sm:$0xff]  ;;  %v93_v4 = vld [vmem:[#allocation6 + $0x58] sm:$0xff] }
  0x10   :  { %v144_v5 = vld [vmem:[#allocation8 + $0x78] sm:$0xff]  ;;  %v143_v6 = vld [vmem:[#allocation8 + $0x70] sm:$0xff]  ;;  %v142_v8 = vld [vmem:[#allocation8 + $0x68] sm:$0xff] }
  0x11   :  { %103 = vmatpush.msra.mxu0 %v96_v1  ;;  %266 = vmatpush.msra.mxu2 %v96_v1  ;;  %v92_v7 = vld [vmem:[#allocation6 + $0x50] sm:$0xff]  ;;  %v91_v9 = vld [vmem:[#allocation6 + $0x48] sm:$0xff]  ;;  %v141_v10 = vld [vmem:[#allocation8 + $0x60] sm:$0xff] }
  0x12   :  { %145 = vmatpush.msra.mxu1 %v144_v5  ;;  %281 = vmatpush.msra.mxu3 %v144_v5  ;;  %v90_v11 = vld [vmem:[#allocation6 + $0x40] sm:$0xff]  ;;  %v140_v12 = vld [vmem:[#allocation8 + $0x58] sm:$0xff]  ;;  %v139_v14 = vld [vmem:[#allocation8 + $0x50] sm:$0xff] }
  0x13   :  { %104 = vmatpush.msra.mxu0 %v95_v2  ;;  %267 = vmatpush.msra.mxu2 %v95_v2  ;;  %v89_v13 = vld [vmem:[#allocation6 + $0x38] sm:$0xff]  ;;  %v88_v15 = vld [vmem:[#allocation6 + $0x30] sm:$0xff]  ;;  %v138_v16 = vld [vmem:[#allocation8 + $0x48] sm:$0xff] }
  0x14   :  { %146 = vmatpush.msra.mxu1 %v143_v6  ;;  %282 = vmatpush.msra.mxu3 %v143_v6  ;;  %v87_v17 = vld [vmem:[#allocation6 + $0x28] sm:$0xff]  ;;  %v137_v18 = vld [vmem:[#allocation8 + $0x40] sm:$0xff]  ;;  %v136_v20 = vld [vmem:[#allocation8 + $0x38] sm:$0xff] }
  0x15   :  { %105 = vmatpush.msra.mxu0 %v94_v3  ;;  %268 = vmatpush.msra.mxu2 %v94_v3  ;;  %v86_v19 = vld [vmem:[#allocation6 + $0x20] sm:$0xff]  ;;  %v85_v21 = vld [vmem:[#allocation6 + $0x18] sm:$0xff]  ;;  %v135_v22 = vld [vmem:[#allocation8 + $0x30] sm:$0xff] }
  0x16   :  { %147 = vmatpush.msra.mxu1 %v142_v8  ;;  %283 = vmatpush.msra.mxu3 %v142_v8  ;;  %v84_v23 = vld [vmem:[#allocation6 + $0x10] sm:$0xff]  ;;  %v134_v24 = vld [vmem:[#allocation8 + $0x28] sm:$0xff]  ;;  %v133_v26 = vld [vmem:[#allocation8 + $0x20] sm:$0xff] }
  0x17   :  { %106 = vmatpush.msra.mxu0 %v93_v4  ;;  %269 = vmatpush.msra.mxu2 %v93_v4  ;;  %v83_v25 = vld [vmem:[#allocation6 + $0x8] sm:$0xff]  ;;  %v82_v27 = vld [vmem:[#allocation6] sm:$0xff]  ;;  %v80_v28 = vld [vmem:[#allocation3] sm:$0xff] }
  0x18   :  { %148 = vmatpush.msra.mxu1 %v141_v10  ;;  %284 = vmatpush.msra.mxu3 %v141_v10  ;;  %v81_v29 = vld [vmem:[#allocation3 + $0x8] sm:$0xff]  ;;  %v131_v31 = vld [vmem:[#allocation8 + $0x10] sm:$0xff]  ;;  %v130_v32 = vld [vmem:[#allocation8 + $0x8] sm:$0xff] }
  0x19   :  { %107 = vmatpush.msra.mxu0 %v92_v7  ;;  %270 = vmatpush.msra.mxu2 %v92_v7  ;;  %v132_v30 = vld [vmem:[#allocation8 + $0x18] sm:$0xff]  ;;  %v129_v33 = vld [vmem:[#allocation8] sm:$0xff]  ;;  %v303_v34 = vld [vmem:[%s497_s2] ss:$0 sm:$0xff] }
  0x1a   :  { %149 = vmatpush.msra.mxu1 %v140_v12  ;;  %285 = vmatpush.msra.mxu3 %v140_v12  ;;  %v304_v41 = vld [vmem:[%s499_s4] ss:$0 sm:$0xff] }
  0x1b   :  { %108 = vmatpush.msra.mxu0 %v91_v9  ;;  %271 = vmatpush.msra.mxu2 %v91_v9  ;;  %v305_v9 = vld [vmem:[%s500_s5] ss:$0 sm:$0xff]  ;;  %s418_s5 = smov [#allocation9]  }
  0x1c   :  { %150 = vmatpush.msra.mxu1 %v139_v14  ;;  %286 = vmatpush.msra.mxu3 %v139_v14  ;;  %s249_s21 = sshll.u32 %s418_s5, 4  ;;  %s250_s21 = int_to_ptr.vmem [resolvable:$true] %s249_s21 }
  0x1d   :  { %109 = vmatpush.msra.mxu0 %v90_v11  ;;  %272 = vmatpush.msra.mxu2 %v90_v11 }
  0x1e   :  { %151 = vmatpush.msra.mxu1 %v138_v16  ;;  %287 = vmatpush.msra.mxu3 %v138_v16 }
  0x1f   :  { %110 = vmatpush.msra.mxu0 %v89_v13  ;;  %273 = vmatpush.msra.mxu2 %v89_v13  ;;  %v306_v13 = vld [vmem:[%s501_s6] ss:$0 sm:$0xff]  ;;  %s251_s6 = sshll.u32 %s502_s7, 4  ;;  %s252_s6 = int_to_ptr.hbm [resolvable:$true] %s251_s6 }
  0x20   :  { %152 = vmatpush.msra.mxu1 %v137_v18  ;;  %288 = vmatpush.msra.mxu3 %v137_v18 }
  0x21   :  { %111 = vmatpush.msra.mxu0 %v88_v15  ;;  %274 = vmatpush.msra.mxu2 %v88_v15 }
  0x22   :  { %153 = vmatpush.msra.mxu1 %v136_v20  ;;  %289 = vmatpush.msra.mxu3 %v136_v20 }
  0x23   :  { %112 = vmatpush.msra.mxu0 %v87_v17  ;;  %275 = vmatpush.msra.mxu2 %v87_v17 }
  0x24   :  { %154 = vmatpush.msra.mxu1 %v135_v22  ;;  %290 = vmatpush.msra.mxu3 %v135_v22 }
  0x25   :  { %113 = vmatpush.msra.mxu0 %v86_v19  ;;  %276 = vmatpush.msra.mxu2 %v86_v19 }
  0x26   :  { %155 = vmatpush.msra.mxu1 %v134_v24  ;;  %291 = vmatpush.msra.mxu3 %v134_v24 }
  0x27   :  { %114 = vmatpush.msra.mxu0 %v85_v21  ;;  %277 = vmatpush.msra.mxu2 %v85_v21 }
  0x28   :  { %156 = vmatpush.msra.mxu1 %v133_v26  ;;  %292 = vmatpush.msra.mxu3 %v133_v26 }
  0x29   :  { %115 = vmatpush.msra.mxu0 %v84_v23  ;;  %278 = vmatpush.msra.mxu2 %v84_v23 }
  0x2a   :  { %157 = vmatpush.msra.mxu1 %v132_v30  ;;  %293 = vmatpush.msra.mxu3 %v132_v30 }
  0x2b   :  { %116 = vmatpush.msra.mxu0 %v83_v25  ;;  %279 = vmatpush.msra.mxu2 %v83_v25 }
  0x2c   :  { %158 = vmatpush.msra.mxu1 %v131_v31  ;;  %294 = vmatpush.msra.mxu3 %v131_v31 }
  0x2d   :  { %117 = vmatpush.msra.mxu0 %v82_v27  ;;  %280 = vmatpush.msra.mxu2 %v82_v27 }
  0x2e   :  { %118 = vmatmul.f32.vlgmr.msra.gmra.mxu0 %v80_v28  ;;  %121 = vmatmul.f32.vlgmr.msra.gmra.mxu2 %v81_v29 }
  0x2f   :  { %159 = vmatpush.msra.mxu1 %v130_v32  ;;  %295 = vmatpush.msra.mxu3 %v130_v32 }
  0x31   :  { %160 = vmatpush.msra.mxu1 %v129_v33  ;;  %296 = vmatpush.msra.mxu3 %v129_v33 }
  0xab   :  { %v119_v35 = vpop.f32.mrf.mxu0 }
  0xac   :  { %v120_v36 = vadd.f32 %v303_v34, %v119_v35 }
  0xae   :  { %v125_v37 = vmax.f32 %v120_v36, 0.0 }
  0xb0   :  { %161 = vmatmul.f32.vlgmr.msra.gmra.mxu1 %v125_v37 }
  0xb1   :  { %v122_v38 = vpop.f32.mrf.mxu2 }
  0xb2   :  { %v123_v39 = vadd.f32 %v303_v34, %v122_v38 }
  0xb4   :  { %v126_v40 = vmax.f32 %v123_v39, 0.0 }
  0xb6   :  { %164 = vmatmul.f32.vlgmr.msra.gmra.mxu3 %v126_v40 }
 0x12d   :  { %v162_v42 = vpop.f32.mrf.mxu1 }
 0x12e   :  { %v177_v43 = vadd.f32 %v162_v42, %v80_v28 }
 0x130   :  { %v183_v44 = vadd.f32 %v304_v41, %v177_v43 }
 0x132   :  { %185 = vadd.xlane.f32.xlu0 %v183_v44  ;;  %v191_v45 = vmul.f32 %v183_v44, %v183_v44 }
 0x134   :  { %193 = vadd.xlane.f32.xlu1 %v191_v45 }
 0x139   :  { %v165_v46 = vpop.f32.mrf.mxu3 }
 0x13a   :  { %v178_v47 = vadd.f32 %v165_v46, %v81_v29 }
 0x13c   :  { %v184_v48 = vadd.f32 %v304_v41, %v178_v47 }
 0x13e   :  { %187 = vadd.xlane.f32.xlu0 %v184_v48  ;;  %v192_v49 = vmul.f32 %v184_v48, %v184_v48 }
 0x140   :  { %195 = vadd.xlane.f32.xlu1 %v192_v49 }
 0x1a5   :  { %v186_v50 = vpop.xlane.xlu0 %185 }
 0x1a6   :  { %v189_v51 = vmul.f32 0.03125, %v186_v50 }
 0x1a7   :  { %v194_v52 = vpop.xlane.xlu1 %193 }
 0x1a8   :  { %v199_v53 = vmul.f32 %v189_v51, %v189_v51  ;;  %v197_v54 = vmul.f32 0.03125, %v194_v52  ;;  %v205_v8 = vsub.f32 %v183_v44, %v189_v51 }
 0x1aa   :  { %v201_v55 = vsub.f32 %v197_v54, %v199_v53 }
 0x1ac   :  { %v203_v56 = vmax.f32 %v201_v55, 0.0 }
 0x1ae   :  { %v207_v57 = vadd.f32 1e-05, %v203_v56 }
 0x1b0   :  { %307 = vrsqrt.f32 %v207_v57  ;;  %vm215_vm1 = vweird.f32 %v207_v57 }
 0x1b1   :  { %v188_v58 = vpop.xlane.xlu0 %187 }
 0x1b2   :  { %v190_v59 = vmul.f32 0.03125, %v188_v58 }
 0x1b3   :  { %v196_v60 = vpop.xlane.xlu1 %195 }
 0x1b4   :  { %v200_v61 = vmul.f32 %v190_v59, %v190_v59  ;;  %v198_v62 = vmul.f32 0.03125, %v196_v60  ;;  %v206_v21 = vsub.f32 %v184_v48, %v190_v59 }
 0x1b6   :  { %v308_v63 = vpop.eup %307  ;;  %v202_v0 = vsub.f32 %v198_v62, %v200_v61 }
 0x1b7   :  { %v210_v1 = vmul.f32 %v308_v63, %v207_v57  ;;  %vm216_vm0 = vweird.f32 %v308_v63 }
 0x1b8   :  { %v204_v2 = vmax.f32 %v202_v0, 0.0  ;;  %vm217_vm2 = vmor %vm215_vm1, %vm216_vm0 }
 0x1b9   :  { %v211_v3 = vmul.f32 %v308_v63, %v210_v1 }
 0x1ba   :  { %v208_v4 = vadd.f32 1e-05, %v204_v2 }
 0x1bb   :  { %v212_v5 = vmul.f32 0.5, %v211_v3 }
 0x1bc   :  { %309 = vrsqrt.f32 %v208_v4  ;;  %vm225_vm4 = vweird.f32 %v208_v4 }
 0x1bd   :  { %v213_v6 = vsub.f32 1.5, %v212_v5 }
 0x1bf   :  { %v214_v7 = vmul.f32 %v308_v63, %v213_v6 }
 0x1c1   :  { %v218_v10 = vsel %vm217_vm2, %v308_v63, %v214_v7 }
 0x1c2   :  { %v310_v11 = vpop.eup %309  ;;  %v229_v12 = vmul.f32 %v218_v10, %v205_v8 }
 0x1c3   :  { %v220_v14 = vmul.f32 %v310_v11, %v208_v4  ;;  %vm226_vm3 = vweird.f32 %v310_v11 }
 0x1c4   :  { %v235_v15 = vmul.f32 %v305_v9, %v229_v12  ;;  %vm227_vm5 = vmor %vm225_vm4, %vm226_vm3 }
 0x1c5   :  { %v221_v16 = vmul.f32 %v310_v11, %v220_v14 }
 0x1c6   :  { %v241_v17 = vadd.f32 %v306_v13, %v235_v15 }
 0x1c7   :  { %v222_v18 = vmul.f32 0.5, %v221_v16 }
 0x1c8   :  { %243 = vst [vmem:[#allocation9] sm:$0xff] %v241_v17 }
 0x1c9   :  { %v223_v19 = vsub.f32 1.5, %v222_v18 }
 0x1cb   :  { %v224_v20 = vmul.f32 %v310_v11, %v223_v19 }
 0x1cd   :  { %v228_v22 = vsel %vm227_vm5, %v310_v11, %v224_v20 }
 0x1ce   :  { %v230_v23 = vmul.f32 %v228_v22, %v206_v21 }
 0x1d0   :  { %v236_v24 = vmul.f32 %v305_v9, %v230_v23 }
 0x1d2   :  { %v242_v25 = vadd.f32 %v306_v13, %v236_v24 }
 0x1d4   :  { %244 = vst [vmem:[#allocation9 + $0x8] sm:$0xff] %v242_v25 }
 0x1d5   :  { %257 = dma.vmem_to_hbm [thread:$0]  %s250_s21, 256, %s252_s6, [#allocation5], %s414_s9, %s414_s9, %s415_s10  }
 0x1d6   :  { %411 = dma.done.wait [#allocation5], 256  }
 0x1d7   :  { %412 = vsyncadd [#allocation5], 4294967040 }
 0x1d8   :  { %262 = vsyncpa [#allocation4], 1 }
 0x1d9   :  { %263 = vsyncpa [#allocation7], 1 }
 0x1da   :  { %264 = vsyncpa [#allocation5], 1 }

</bundles_post_ra>
